<compile_context>
chip_gen: v7x
topology: tpu7x:2x2x1
jax: 0.10.0
libtpu: 0.0.40
codegen_flags: <defaults>
</compile_context>

<pallas_src>
import functools

import jax
import jax.numpy as jnp
from jax.experimental import pallas as pl
from jax.experimental.pallas import tpu as pltpu


D_IN, D_HID, D_OUT = 20, 256, 10


def mlp_kernel(x_ref, w1_ref, b1_ref, w2_ref, b2_ref, o_ref, *, bf16_epilogue):
    # hidden: Linear(20, 256) -- bf16 MXU operands, f32 accumulate.
    x = x_ref[...].astype(jnp.bfloat16)
    h = jnp.dot(x, w1_ref[...], preferred_element_type=jnp.float32)

    # Bias add + ReLU epilogue. bf16 on chips with a bf16 VALU (v6e/v7x)
    # halves the VPU op count over the (TM, 256) intermediate; f32 on v5e.
    if bf16_epilogue:
        b1 = b1_ref[...].astype(jnp.bfloat16)                  # (1, 256)
        h = jnp.maximum(h.astype(jnp.bfloat16) + b1, jnp.bfloat16(0))
    else:
        h = jnp.maximum(h + b1_ref[...], 0.0).astype(jnp.bfloat16)

    # out: Linear(256, 10)
    y = jnp.dot(h, w2_ref[...], preferred_element_type=jnp.float32) + b2_ref[...]
    o_ref[...] = y.astype(o_ref.dtype)


@functools.partial(jax.jit, static_argnames=("tm",))
def mlp_forward(x, params, *, tm=4096):
    """x: (B, 20) float32. params: dict with bf16 transposed weights, f32 biases."""
    B = x.shape[0]

    # Tile size: multiple of 8 sublanes, capped at `tm`. Target >= 2 tiles so
    # the "parallel" batch axis can be sharded across v7x's 2 TensorCores.
    tm_target = max(8, pl.cdiv(pl.cdiv(B, 2), 8) * 8)
    TM = min(tm, tm_target)
    n_tiles = pl.cdiv(B, TM)        # last tile may overhang; Pallas masks it.

    w1, b1, w2, b2 = params["w1"], params["b1"], params["w2"], params["b2"]

    # bf16 epilogue only where the VPU has native bf16 (not v5e).
    device_kind = jax.devices()[0].device_kind.lower()
    bf16_epilogue = "v5" not in device_kind

    cost = pl.CostEstimate(
        flops=2 * B * (D_IN * D_HID + D_HID * D_OUT),
        transcendentals=0,
        bytes_accessed=(B * (D_IN + D_OUT) * 4
                        + (D_IN * D_HID + D_HID * D_OUT) * 2
                        + (D_HID + D_OUT) * 4),
    )

    out = pl.pallas_call(
        functools.partial(mlp_kernel, bf16_epilogue=bf16_epilogue),
        out_shape=jax.ShapeDtypeStruct((B, D_OUT), jnp.float32),
        grid=(n_tiles,),
        in_specs=[
            pl.BlockSpec((TM, D_IN), lambda i: (i, 0)),        # x: tiled over batch
            pl.BlockSpec((D_IN, D_HID), lambda i: (0, 0)),     # w1: resident
            pl.BlockSpec((1, D_HID), lambda i: (0, 0)),        # b1: resident
            pl.BlockSpec((D_HID, D_OUT), lambda i: (0, 0)),    # w2: resident
            pl.BlockSpec((1, D_OUT), lambda i: (0, 0)),        # b2: resident
        ],
        out_specs=pl.BlockSpec((TM, D_OUT), lambda i: (i, 0)),
        compiler_params=pltpu.CompilerParams(
            dimension_semantics=("parallel",),
            vmem_limit_bytes=48 * 1024 * 1024,
        ),
        cost_estimate=cost,
    )(x, w1, b1, w2, b2)

    return out


def init_params(key):
    """Deterministic init mimicking PyTorch nn.Linear defaults:
    U(-1/sqrt(fan_in), 1/sqrt(fan_in)) for weight and bias.
    Weights stored transposed (in, out) and cast to bf16 for the MXU."""
    def linear_init(k, fan_in, fan_out):
        kw, kb = jax.random.split(k)
        bound = 1.0 / jnp.sqrt(float(fan_in))
        w = jax.random.uniform(kw, (fan_in, fan_out), jnp.float32, -bound, bound)
        b = jax.random.uniform(kb, (1, fan_out), jnp.float32, -bound, bound)
        return w.astype(jnp.bfloat16), b

    k1, k2 = jax.random.split(key)
    w1, b1 = linear_init(k1, D_IN, D_HID)
    w2, b2 = linear_init(k2, D_HID, D_OUT)
    return {"w1": w1, "b1": b1, "w2": w2, "b2": b2}


def mlp_ref(x, p):
    """Pure-JAX reference (f32 weights) for correctness check."""
    w1 = p["w1"].astype(jnp.float32)
    w2 = p["w2"].astype(jnp.float32)
    h = jnp.maximum(x @ w1 + p["b1"], 0.0)
    return h @ w2 + p["b2"]


if __name__ == "__main__":
    key = jax.random.PRNGKey(0)
    kx, kp = jax.random.split(key)

    batch = 8
    x = jax.random.normal(kx, (batch, D_IN), dtype=jnp.float32)
    params = init_params(kp)

    out = mlp_forward(x, params)
    out = jax.block_until_ready(out)

    ref = mlp_ref(x, params)
    assert out.shape == (batch, D_OUT), out.shape
    # bf16 MXU operands -> loosened tolerance vs the f32 reference.
    # TODO(synk): bf16 weights/activations differ from true f32 nn.Linear
    # numerics at ~1e-2 relative error (fine for inference).
    assert jnp.allclose(out, ref, atol=3e-2, rtol=3e-2), "mismatch vs reference"

    print("KERNEL_OK")
</pallas_src>

<mosaic_0001>
module attributes {stable_mosaic.version = 11 : i64} {
  func.func @mlp_kernel(%arg0: i32, %arg1: memref<8x20xf32, #tpu.memory_space<vmem>>, %arg2: memref<20x256xbf16, #tpu.memory_space<vmem>>, %arg3: memref<1x256xf32, #tpu.memory_space<vmem>>, %arg4: memref<256x10xbf16, #tpu.memory_space<vmem>>, %arg5: memref<1x10xf32, #tpu.memory_space<vmem>>, %arg6: memref<8x10xf32, #tpu.memory_space<vmem>>) attributes {dimension_semantics = [#tpu.dimension_semantics<parallel>], iteration_bounds = array<i64: 1>, scalar_prefetch = 0 : i64, scratch_operands = 0 : i64, tpu.core_type = #tpu.core_type<tc>, window_params = [{transform_indices = @transform_0, window_bounds = array<i64: 8, 20>}, {pipeline_mode = #tpu.pipeline_mode<synchronous>, transform_indices = @transform_1, window_bounds = array<i64: 20, 256>}, {pipeline_mode = #tpu.pipeline_mode<synchronous>, transform_indices = @transform_2, window_bounds = array<i64: 1, 256>}, {pipeline_mode = #tpu.pipeline_mode<synchronous>, transform_indices = @transform_3, window_bounds = array<i64: 256, 10>}, {pipeline_mode = #tpu.pipeline_mode<synchronous>, transform_indices = @transform_4, window_bounds = array<i64: 1, 10>}, {transform_indices = @transform_5, window_bounds = array<i64: 8, 10>}]} {
    %c0 = arith.constant 0 : index
    %c0_0 = arith.constant 0 : index
    %0 = vector.load %arg1[%c0, %c0_0] : memref<8x20xf32, #tpu.memory_space<vmem>>, vector<8x20xf32>
    %1 = arith.truncf %0 : vector<8x20xf32> to vector<8x20xbf16>
    %c0_1 = arith.constant 0 : index
    %c0_2 = arith.constant 0 : index
    %2 = vector.load %arg2[%c0_1, %c0_2] : memref<20x256xbf16, #tpu.memory_space<vmem>>, vector<20x256xbf16>
    %cst = arith.constant dense<0.000000e+00> : vector<8x256xf32>
    %3 = tpu.matmul %1, %2, %cst {dimension_numbers = #tpu.dot_dimension_numbers<[1], [0], [0], [1], [0, 0, 1, 1], [], []>} : vector<8x20xbf16>, vector<20x256xbf16>, vector<8x256xf32> -> vector<8x256xf32>
    %c0_3 = arith.constant 0 : index
    %c0_4 = arith.constant 0 : index
    %4 = vector.load %arg3[%c0_3, %c0_4] : memref<1x256xf32, #tpu.memory_space<vmem>>, vector<1x256xf32>
    %5 = arith.truncf %4 : vector<1x256xf32> to vector<1x256xbf16>
    %6 = arith.truncf %3 : vector<8x256xf32> to vector<8x256xbf16>
    %7 = vector.broadcast %5 : vector<1x256xbf16> to vector<8x256xbf16>
    %8 = arith.addf %6, %7 : vector<8x256xbf16>
    %cst_5 = arith.constant 0.000000e+00 : bf16
    %9 = vector.broadcast %cst_5 : bf16 to vector<8x256xbf16>
    %10 = arith.maximumf %8, %9 : vector<8x256xbf16>
    %c0_6 = arith.constant 0 : index
    %c0_7 = arith.constant 0 : index
    %11 = vector.load %arg4[%c0_6, %c0_7] : memref<256x10xbf16, #tpu.memory_space<vmem>>, vector<256x10xbf16>
    %cst_8 = arith.constant dense<0.000000e+00> : vector<8x10xf32>
    %12 = tpu.matmul %10, %11, %cst_8 {dimension_numbers = #tpu.dot_dimension_numbers<[1], [0], [0], [1], [0, 0, 1, 1], [], []>} : vector<8x256xbf16>, vector<256x10xbf16>, vector<8x10xf32> -> vector<8x10xf32>
    %c0_9 = arith.constant 0 : index
    %c0_10 = arith.constant 0 : index
    %13 = vector.load %arg5[%c0_9, %c0_10] : memref<1x10xf32, #tpu.memory_space<vmem>>, vector<1x10xf32>
    %14 = vector.broadcast %13 : vector<1x10xf32> to vector<8x10xf32>
    %15 = arith.addf %12, %14 : vector<8x10xf32>
    %c0_11 = arith.constant 0 : index
    %c0_12 = arith.constant 0 : index
    %16 = vector.load %arg6[%c0_11, %c0_12] : memref<8x10xf32, #tpu.memory_space<vmem>>, vector<8x10xf32>
    tpu.vector_store %arg6[%c0_11, %c0_12], %15 {strides = array<i32>} : memref<8x10xf32, #tpu.memory_space<vmem>>, vector<8x10xf32>,
    return
  }
  func.func @transform_0(%arg0: i32) -> (i32, i32) {
    %c0_i32 = arith.constant 0 : i32
    %c0_i32_0 = arith.constant 0 : i32
    return %arg0, %c0_i32 : i32, i32
  }
  func.func @transform_1(%arg0: i32) -> (i32, i32) {
    %c0_i32 = arith.constant 0 : i32
    %c0_i32_0 = arith.constant 0 : i32
    %c0_i32_1 = arith.constant 0 : i32
    return %c0_i32, %c0_i32_0 : i32, i32
  }
  func.func @transform_2(%arg0: i32) -> (i32, i32) {
    %c0_i32 = arith.constant 0 : i32
    %c0_i32_0 = arith.constant 0 : i32
    %c0_i32_1 = arith.constant 0 : i32
    return %c0_i32, %c0_i32_0 : i32, i32
  }
  func.func @transform_3(%arg0: i32) -> (i32, i32) {
    %c0_i32 = arith.constant 0 : i32
    %c0_i32_0 = arith.constant 0 : i32
    %c0_i32_1 = arith.constant 0 : i32
    return %c0_i32, %c0_i32_0 : i32, i32
  }
  func.func @transform_4(%arg0: i32) -> (i32, i32) {
    %c0_i32 = arith.constant 0 : i32
    %c0_i32_0 = arith.constant 0 : i32
    %c0_i32_1 = arith.constant 0 : i32
    return %c0_i32, %c0_i32_0 : i32, i32
  }
  func.func @transform_5(%arg0: i32) -> (i32, i32) {
    %c0_i32 = arith.constant 0 : i32
    %c0_i32_0 = arith.constant 0 : i32
    return %arg0, %c0_i32 : i32, i32
  }
}

</mosaic_0001>

<bundles_post_ra>
// kernel: mlp_forward.1
= control target key start
LH: loop header
LB: loop body
LE: loop exit
PB: predicated region body
PF: predicated region fallthrough
CT: control target
= control target key end

     0   :  { %vm46_vm0 = vcmask 1041408   ;;  %v411_v3 = vmov 0   ;;  %vm42_vm1 = vcmask 162816   ;;  %s524_s0 = inlined_call_operand.vmem [shape: f32[8,20], index: 0, kind: input, shape index: {}]   ;;  %s525_s1 = inlined_call_operand.vmem [shape: bf16[20,256], index: 1, kind: input, shape index: {}]   ;;  %s526_s2 = inlined_call_operand.vmem [shape: f32[1,256], index: 2, kind: input, shape index: {}]   ;;  %s527_s3 = inlined_call_operand.vmem [shape: bf16[256,10], index: 3, kind: input, shape index: {}]   ;;  %s528_s4 = inlined_call_operand.vmem [shape: f32[1,10], index: 4, kind: input, shape index: {}]   ;;  %s529_s5 = inlined_call_operand.hbm [shape: f32[8,10], index: 5, kind: output, shape index: {}]  }
   0x1   :  { %v366_v0 = vld [vmem:[%s525_s1 + $0x4] ss:$8 sps:$4 sm:$0xff]   ;;  %v368_v1 = vld [vmem:[%s525_s1] ss:$8 sps:$4 sm:$0xff]   ;;  %v26_v2 = vld [vmem:[%s525_s1 + $0x10] sm:$0x33]  ;;  %85 = vmatprep.mubr.bf16.mxu0 %v411_v3 }
   0x2   :  { %v22_v4 = vld [vmem:[%s524_s0] sm:$0xff]  ;;  %53 = vmatprep.subr.bf16.mxu0 %v366_v0  ;;  %v322_v5 = vcombine.high %v26_v2, %v26_v2  ;;  %v321_v6 = vcombine.low %v26_v2, %v26_v2  ;;  %v373_v10 = vld [vmem:[%s527_s3 + $0x48] sm:$0xff]   ;;  %v375_v13 = vld [vmem:[%s527_s3 + $0x50] sm:$0xff]  }
   0x3   :  { %v371_v7 = vld [vmem:[%s527_s3 + $0x40] sm:$0xff]   ;;  %54 = vmatpush1.bf16.msra.mxu0 %v368_v1  ;;  %v374_v11 = vld [vmem:[%s527_s3 + $0x8] sm:$0xff]   ;;  %v23_v12 = vpack.c.bf16 %v22_v4, %v22_v4  ;;  %v376_v14 = vld [vmem:[%s527_s3 + $0x10] sm:$0xff]  }
   0x4   :  { %v372_v8 = vld [vmem:[%s527_s3] sm:$0xff]   ;;  %323 = vmatprep.subr.msk.bf16.mxu0 %vm46_vm0, %v322_v5  ;;  %v48_v9 = vsel %vm46_vm0, %v321_v6, 0  ;;  %342 = vmatprep.subr.bf16.mxu1 %v371_v7  ;;  %v377_v15 = vld [vmem:[%s527_s3 + $0x58] sm:$0xff]  }
   0x5   :  { %343 = vmatpush3.bf16.msra.mxu1 %v372_v8  ;;  %v378_v16 = vld [vmem:[%s527_s3 + $0x18] sm:$0xff]   ;;  %v379_v17 = vld [vmem:[%s527_s3 + $0x60] sm:$0xff]  }
   0x6   :  { %344 = vmatprep.subr.bf16.mxu1 %v373_v10 }
   0x7   :  { %56 = vmatpush1.bf16.msra.mxu0 %v48_v9 }
   0x9   :  { %345 = vmatpush3.bf16.msra.mxu1 %v374_v11 }
   0xa   :  { %324 = vmatmul.mubr.msk.bf16.vlgmr.msra.gmra.mrb[0].mxu0 %vm42_vm1, %v23_v12  ;;  %346 = vmatprep.subr.bf16.mxu1 %v375_v13 }
   0xd   :  { %347 = vmatpush3.bf16.msra.mxu1 %v376_v14 }
   0xe   :  { %348 = vmatprep.subr.bf16.mxu1 %v377_v15 }
   0xf   :  { %10 = vsyncpa [#allocation3], 0  ;;  %v380_v18 = vld [vmem:[%s527_s3 + $0x20] sm:$0xff]   ;;  %v381_v19 = vld [vmem:[%s527_s3 + $0x68] sm:$0xff]   ;;  %v96_v25 = vlaneseq  ;;  %s412_s6 = smov [#allocation2]   ;;  %vm303_vm2 = vcmask 80896  }
  0x10   :  { %v382_v20 = vld [vmem:[%s527_s3 + $0x28] sm:$0xff]   ;;  %v383_v21 = vld [vmem:[%s527_s3 + $0x70] sm:$0xff]   ;;  %v385_v23 = vld [vmem:[%s527_s3 + $0x78] sm:$0xff]   ;;  %s311_s7 = sshll.u32 %s412_s6, 4  ;;  %s312_s7 = int_to_ptr.vmem [resolvable:$true] %s311_s7 }
  0x11   :  { %349 = vmatpush3.bf16.msra.mxu1 %v378_v16  ;;  %v384_v22 = vld [vmem:[%s527_s3 + $0x30] sm:$0xff]   ;;  %v386_v24 = vld [vmem:[%s527_s3 + $0x38] sm:$0xff]   ;;  %v97_v26 = vshrl.u32 %v96_v25, 7  ;;  %v94_v28 = vld [vmem:[%s526_s2] sm:$0x3]  ;;  %s387_s8 = scalar_lea.vmem %s312_s7, 128  ;;  %p392_p1 = scmp.lt.s32.totalorder %s312_s7, %s312_s7 }
  0x12   :  { %350 = vmatprep.subr.bf16.mxu1 %v379_v17  ;;  %v325_v49 = vld [vmem:[%s528_s4] ss:$0 sm:$0xff]  ;;  %p388_p0 = scmp.ne.s32.totalorder %s312_s7, %s387_s8  ;;  %p393_p2 = scmp.lt.s32.totalorder %s387_s8, %s387_s8 }
  0x13   :  { %v98_v27 = vsub.s32 0, %v97_v26  ;;  %v102_v29 = vsub.s32 1, %v97_v26 }
  0x14   :  { %p394_p3 = por %p393_p2, %p392_p1 }
  0x15   :  { %351 = vmatpush3.bf16.msra.mxu1 %v380_v18  ;;  %v99_v30 = vrot.slane %v94_v28, %v98_v27  ;;  %v103_v31 = vrot.slane %v94_v28, %v102_v29 }
  0x16   :  { %352 = vmatprep.subr.bf16.mxu1 %v381_v19  ;;  %p395_p4 = pnand %p394_p3, %p388_p0 }
  0x17   :  { %v106_v32 = vpack.c.bf16 %v99_v30, %v99_v30  ;;  %v107_v33 = vpack.c.bf16 %v103_v31, %v103_v31 }
  0x19   :  { %353 = vmatpush3.bf16.msra.mxu1 %v382_v20  ;;  %v111_v34 = vpack.i.b16 %v106_v32, %v106_v32  ;;  %v118_v35 = vpack.i.b16 %v107_v33, %v107_v33 }
  0x1a   :  { %354 = vmatprep.subr.bf16.mxu1 %v383_v21 }
  0x1b   :  { %v116_v36 = vrot.slane %v111_v34, %v98_v27  ;;  %v123_v38 = vrot.slane %v118_v35, %v98_v27 }
  0x1d   :  { %355 = vmatpush3.bf16.msra.mxu1 %v384_v22 }
  0x1e   :  { %356 = vmatprep.subr.bf16.mxu1 %v385_v23 }
  0x21   :  { %357 = vmatpush3.bf16.msra.mxu1 %v386_v24 }
  0xdd   :  { %v87_v37 = vpop.f32.mrb[0].mxu0 }
  0xde   :  { %v108_v39 = vpack.c.bf16 %v87_v37, %v87_v37  ;;  %v89_v40 = vpop.f32.mrb[1].mxu0 }
  0xdf   :  { %v109_v41 = vpack.c.bf16 %v89_v40, %v89_v40  ;;  %v91_v42 = vpop.f32.mrb[2].mxu0 }
  0xe0   :  { %v124_v43 = vadd.bf16 %v116_v36, %v108_v39  ;;  %v92_v44 = vpop.f32.mrb[3].mxu0 }
  0xe1   :  { %v125_v45 = vadd.bf16 %v123_v38, %v109_v41 }
  0xe2   :  { %v126_v47 = vmax.bf16 %v411_v3, %v124_v43 }
  0xe3   :  { %v127_v46 = vmax.bf16 %v411_v3, %v125_v45 }
  0xe5   :  { %295 = vmatprep.mubr.bf16.mxu1 %v127_v46 }
  0xe6   :  { %296 = vmatmul.mubr.bf16.vlgmr.msra.gmra.mrb[0].mxu1 %v126_v47 }
 0x1b9   :  { %v358_v48 = vpop.f32.mrb[0].mxu1 }
 0x1ba   :  { %v359_v50 = vpop.f32.mrb[1].mxu1 }
 0x1bb   :  { %v360_v51 = vadd.f32 %v359_v50, %v358_v48  ;;  %v361_v52 = vpop.f32.mrb[2].mxu1 }
 0x1bc   :  { %v362_v53 = vpop.f32.mrb[3].mxu1 }
 0x1bd   :  { %v298_v54 = vadd.f32 %v360_v51, %v325_v49 }
 0x1bf   :  { %304 = vst.msk [vmem:[#allocation2] sm:$0xff] %vm303_vm2, %v298_v54 }
 0x1c0   :  { %398 = shalt.err (!%p395_p4)
}
 0x1c1   :  { %s399_s4 = scalar_lea.hbm %s529_s5, 128 }
 0x1c2   :  { %p400_p5 = scmp.ne.s32.totalorder %s529_s5, %s399_s4  ;;  %p403_p6 = scmp.lt.u32.totalorder %s399_s4, %s529_s5 }
 0x1c4   :  { %p405_p7 = pnand %p403_p6, %p400_p5 }
 0x1c6   :  { %408 = shalt.err (!%p405_p7)
}
 0x1c7   :  { %314 = dma.vmem_to_hbm [thread:$0]  %s312_s7, 128, %s529_s5, [#allocation3]  }
 0x1c8   :  { %409 = dma.done.wait [#allocation3], 128  }
 0x1c9   :  { %410 = vsyncadd [#allocation3], 4294967168 }
 0x1ca   :  { %318 = vsyncpa [#allocation3], 1 }

</bundles_post_ra>
